<compile_context>
chip_gen: v5e
topology: v5e:2x2
jax: 0.10.0
libtpu: 0.0.40
codegen_flags: <defaults>
</compile_context>

<pallas_src>
import functools

import jax
import jax.numpy as jnp
from jax.experimental import pallas as pl
from jax.experimental.pallas import tpu as pltpu


def linear_sub_kernel(x1_ref, wb_ref, x2_ref, o_ref):
    # wb_ref holds [W^T ; b] stacked along the K axis: shape (K+1, N).
    K = wb_ref.shape[0] - 1
    wb = wb_ref[...]                       # one whole-block load
    w = wb[:K, :]                          # (K, N)
    b = wb[K:, :]                          # (1, N), broadcasts over rows
    # t1 = x1 @ W^T + b ; out = t1 - x2  — one MXU matmul + VPU epilogue.
    t1 = jnp.dot(x1_ref[...], w, preferred_element_type=jnp.float32)
    o_ref[...] = (t1 + b - x2_ref[...]).astype(o_ref.dtype)


@functools.partial(jax.jit, donate_argnums=(2,))
def linear_sub(x1, w_b, x2):
    """out = x1 @ W^T + b - x2.

    Args:
      x1:  (M, K) f32
      w_b: (K+1, N) f32, rows 0..K-1 = W^T, last row = bias
      x2:  (M, N) f32 — DONATED; its buffer becomes the output. Do not reuse.
    """
    M, K = x1.shape
    N = w_b.shape[1]
    vmem = pltpu.MemorySpace.VMEM
    cost = pl.CostEstimate(
        flops=2 * M * K * N,
        bytes_accessed=4 * (M * K + (K + 1) * N + 2 * M * N),
        transcendentals=0,
    )
    return pl.pallas_call(
        linear_sub_kernel,
        out_shape=jax.ShapeDtypeStruct((M, N), x1.dtype),
        # No grid: the whole problem is one VMEM-resident block per operand.
        in_specs=[
            pl.BlockSpec(memory_space=vmem),   # x1   (M, K)
            pl.BlockSpec(memory_space=vmem),   # [W^T; b] (K+1, N)
            pl.BlockSpec(memory_space=vmem),   # x2   (M, N)
        ],
        out_specs=pl.BlockSpec(memory_space=vmem),
        # Output reuses x2's HBM buffer (same shape/dtype; x2's block is fully
        # DMA'd into VMEM before the output writeback, so this is safe).
        input_output_aliases={2: 0},
        cost_estimate=cost,
    )(x1, w_b, x2)


if __name__ == "__main__":
    key = jax.random.PRNGKey(0)
    k1, k2, kw, kb = jax.random.split(key, 4)

    M, K, N = 20, 10, 10

    # Inputs (match torch.randn(20, 10) shapes).
    x1 = jax.random.normal(k1, (M, K), dtype=jnp.float32)
    x2 = jax.random.normal(k2, (M, N), dtype=jnp.float32)

    # Deterministic nn.Linear(10, 10) params: U(-1/sqrt(K), 1/sqrt(K)).
    bound = 1.0 / jnp.sqrt(jnp.float32(K))
    weight = jax.random.uniform(kw, (N, K), dtype=jnp.float32,
                                minval=-bound, maxval=bound)  # torch (out, in)
    bias = jax.random.uniform(kb, (N,), dtype=jnp.float32,
                              minval=-bound, maxval=bound)

    # Fold bias into the weight operand once, outside the jitted hot path.
    w_b = jnp.concatenate([weight.T, bias.reshape(1, N)], axis=0)  # (K+1, N)

    # Reference is computed BEFORE the kernel call because x2 is donated
    # (its HBM buffer becomes the kernel output).
    ref = x1 @ weight.T + bias - x2
    ref = jax.block_until_ready(ref)

    out = linear_sub(x1, w_b, x2)
    out = jax.block_until_ready(out)

    assert jnp.allclose(out, ref, atol=1e-5, rtol=1e-5), "mismatch vs reference"
    print("KERNEL_OK")
</pallas_src>

<mosaic_0001>
module attributes {stable_mosaic.version = 11 : i64} {
  func.func @linear_sub_kernel(%arg0: memref<20x10xf32, #tpu.memory_space<vmem>>, %arg1: memref<11x10xf32, #tpu.memory_space<vmem>>, %arg2: memref<20x10xf32, #tpu.memory_space<vmem>>, %arg3: memref<20x10xf32, #tpu.memory_space<vmem>>) attributes {dimension_semantics = [], scalar_prefetch = 0 : i64, scratch_operands = 0 : i64, tpu.core_type = #tpu.core_type<tc>} {
    %c0 = arith.constant 0 : index
    %c0_0 = arith.constant 0 : index
    %0 = vector.load %arg1[%c0, %c0_0] : memref<11x10xf32, #tpu.memory_space<vmem>>, vector<11x10xf32>
    %1 = vector.extract_strided_slice %0 {offsets = [0, 0], sizes = [10, 10], strides = [1, 1]} : vector<11x10xf32> to vector<10x10xf32>
    %2 = vector.extract_strided_slice %0 {offsets = [10, 0], sizes = [1, 10], strides = [1, 1]} : vector<11x10xf32> to vector<1x10xf32>
    %c0_1 = arith.constant 0 : index
    %c0_2 = arith.constant 0 : index
    %3 = vector.load %arg0[%c0_1, %c0_2] : memref<20x10xf32, #tpu.memory_space<vmem>>, vector<20x10xf32>
    %cst = arith.constant dense<0.000000e+00> : vector<20x10xf32>
    %4 = tpu.matmul %3, %1, %cst {dimension_numbers = #tpu.dot_dimension_numbers<[1], [0], [0], [1], [0, 0, 1, 1], [], []>} : vector<20x10xf32>, vector<10x10xf32>, vector<20x10xf32> -> vector<20x10xf32>
    %5 = vector.broadcast %2 : vector<1x10xf32> to vector<20x10xf32>
    %6 = arith.addf %4, %5 : vector<20x10xf32>
    %c0_3 = arith.constant 0 : index
    %c0_4 = arith.constant 0 : index
    %7 = vector.load %arg2[%c0_3, %c0_4] : memref<20x10xf32, #tpu.memory_space<vmem>>, vector<20x10xf32>
    %8 = arith.subf %6, %7 : vector<20x10xf32>
    %c0_5 = arith.constant 0 : index
    %c0_6 = arith.constant 0 : index
    %9 = vector.load %arg3[%c0_5, %c0_6] : memref<20x10xf32, #tpu.memory_space<vmem>>, vector<20x10xf32>
    tpu.vector_store %arg3[%c0_5, %c0_6], %8 {strides = array<i32>} : memref<20x10xf32, #tpu.memory_space<vmem>>, vector<20x10xf32>,
    return
  }
}

</mosaic_0001>

<bundles_post_ra>
// kernel: linear_sub.1
= control target key start
LH: loop header
LB: loop body
LE: loop exit
PB: predicated region body
PF: predicated region fallthrough
CT: control target
= control target key end

     0   :  { %vm30_vm0 = vcmask 1041408   ;;  %vm20_vm1 = vcmask 80896   ;;  %vm68_vm2 = vcmask 76800   ;;  %s140_s1 = inlined_call_operand.vmem [shape: f32[11,10], index: 1, kind: input, shape index: {}]   ;;  %s141_s0 = inlined_call_operand.vmem [shape: f32[20,10], index: 0, kind: input, shape index: {}]   ;;  %s142_s2 = inlined_call_operand.vmem [shape: f32[20,10], index: 2, kind: input, shape index: {}, may-alias: {2,3}]   ;;  %s143_s3 = inlined_call_operand.vmem [shape: f32[20,10], index: 3, kind: output, shape index: {}, may-alias: {2,3}]  }
   0x1   :  { %v15_v0 = vld [vmem:[%s140_s1 + $0x8] sm:$0x7]  ;;  %v14_v1 = vld [vmem:[%s140_s1] sm:$0xff]  ;;  %v18_v2 = vld [vmem:[%s141_s0 + $0x10] sm:$0xf] }
   0x2   :  { %79 = vmatpush.msk.msra.mxu2 %vm30_vm0, %v15_v0  ;;  %74 = vmatpush.msk.msra.mxu0 %vm30_vm0, %v15_v0  ;;  %v16_v3 = vld [vmem:[%s141_s0] sm:$0xff]  ;;  %v17_v4 = vld [vmem:[%s141_s0 + $0x8] sm:$0xff]  ;;  %v19_v5 = vperm.slane %v15_v0, 2 }
   0x3   :  { %78 = vmatpush.msk.msra.mxu1 %vm30_vm0, %v15_v0  ;;  %v60_v7 = vld [vmem:[%s142_s2] sm:$0xff]  ;;  %v61_v9 = vld [vmem:[%s142_s2 + $0x8] sm:$0xff] }
   0x4   :  { %81 = vmatpush.msra.mxu2 %v14_v1  ;;  %49 = vmatpush.msra.mxu0 %v14_v1 }
   0x5   :  { %77 = vmatmul.msk.f32.vlgmr.msra.gmra.mxu2 %vm20_vm1, %v18_v2  ;;  %80 = vmatpush.msra.mxu1 %v14_v1 }
   0x6   :  { %75 = vmatmul.msk.f32.vlgmr.msra.gmra.mxu0 %vm20_vm1, %v16_v3  ;;  %76 = vmatmul.msk.f32.vlgmr.msra.gmra.mxu1 %vm20_vm1, %v17_v4 }
  0x83   :  { %v51_v6 = vpop.f32.mrf.mxu0  ;;  %v54_v8 = vpop.f32.mrf.mxu1 }
  0x84   :  { %v52_v10 = vadd.f32 %v51_v6, %v19_v5  ;;  %v55_v11 = vadd.f32 %v54_v8, %v19_v5 }
  0x86   :  { %v63_v12 = vsub.f32 %v52_v10, %v60_v7  ;;  %v64_v13 = vsub.f32 %v55_v11, %v61_v9 }
  0x88   :  { %66 = vst.msk [vmem:[%s143_s3] sm:$0xff] %vm20_vm1, %v63_v12  ;;  %v57_v14 = vpop.f32.mrf.mxu2 }
  0x89   :  { %v58_v16 = vadd.f32 %v57_v14, %v19_v5 }
  0x8f   :  { %v62_v15 = vld [vmem:[%s142_s2 + $0x10] sm:$0xf] }
  0x90   :  { %67 = vst.msk [vmem:[%s143_s3 + $0x8] sm:$0xff] %vm20_vm1, %v64_v13  ;;  %v65_v17 = vsub.f32 %v58_v16, %v62_v15 }
  0x92   :  { %69 = vst.msk [vmem:[%s143_s3 + $0x10] sm:$0xf] %vm68_vm2, %v65_v17 }

</bundles_post_ra>
